<compile_context>
chip_gen: v6e
topology: v6e:2x2x1
jax: 0.10.0
libtpu: 0.0.40
codegen_flags: <defaults>
</compile_context>

<pallas_src>
import functools

import jax
import jax.numpy as jnp
from jax.experimental import pallas as pl
from jax.experimental.pallas import tpu as pltpu


def _round_up(v, m):
    return (v + m - 1) // m * m


def _patch_embed_kernel(x_ref, w_ref, row0_ref, pos_ref, out_ref, *, bb, n, k, e):
    # x_ref:    (Bb, N, K)    activations already in (p c) feature order
    # w_ref:    (K, E)        weight.T  (K = P*C, column k = p*C + c)
    # row0_ref: (1, E)        cls_token + positions[0]
    # pos_ref:  (N, E)        positions[1:] + bias
    # out_ref:  (Bb, N+1, E)
    x = x_ref[...]
    if n % 8 == 0:
        # Leading-dim merge only (N is a sublane multiple => free relabeling),
        # then one big-M MXU pass with M = Bb*N, K = P*C.
        acc = jnp.dot(x.reshape(bb * n, k), w_ref[...],
                      preferred_element_type=jnp.float32).reshape(bb, n, e)
    else:
        # Fallback that never reshapes the sublane axis (still a single
        # contraction over K; batch/N stay as leading dims).
        acc = jax.lax.dot_general(
            x, w_ref[...],
            dimension_numbers=(((2,), (0,)), ((), ())),
            preferred_element_type=jnp.float32)
    proj = acc + pos_ref[...][None, :, :]                           # (Bb, N, E)
    row0 = jnp.broadcast_to(row0_ref[...][None, :, :], (bb, 1, e))  # (Bb, 1, E)
    # One aligned full-block store (no sublane-offset partial stores).
    out_ref[...] = jnp.concatenate([row0, proj], axis=1).astype(out_ref.dtype)


def _pick_batch_block(batch, n, k, e, *, target_rows=2048,
                      vmem_budget_bytes=16 * 1024 * 1024):
    """Largest divisor Bb of `batch` whose double-buffered x + out blocks fit
    the VMEM budget (v7x-safe) and whose row count Bb*N stays near the
    MXU-amortizing target; when the batch must be split, prefer M = Bb*N that
    is a multiple of 256 (MXU height on v6e/v7x). No forced >=2-step grid."""
    def block_bytes(bb):
        xb = bb * _round_up(n, 8) * _round_up(k, 128) * 4
        ob = bb * _round_up(n + 1, 8) * _round_up(e, 128) * 4
        return 2 * (xb + ob)          # BlockSpec double-buffers input and output

    divisors = [d for d in range(1, batch + 1) if batch % d == 0]
    feasible = [d for d in divisors
                if block_bytes(d) <= vmem_budget_bytes
                and (d * n <= target_rows or d == 1)]
    if not feasible:
        feasible = [1]                # TODO(synk): would need an N-split here
    best = max(feasible)
    if best < batch:
        aligned = [d for d in feasible if (d * n) % 256 == 0]
        if aligned:
            best = max(aligned)
    return best


def patch_embedding_linear(x, weight, bias, cls_token, positions, patch_size,
                           block_batch=None):
    """Forward of PatchEmbedding_Linear.
    x: (B, C, H, W) f32.  weight: (E, P*C) (PyTorch nn.Linear layout).
    bias: (E,).  cls_token: (1, 1, E).  positions: (N+1, E).
    Returns (B, N+1, E) with N = H * (W // patch_size)."""
    B, C, H, W = x.shape
    P = patch_size
    assert W % P == 0
    N = H * (W // P)
    E = weight.shape[0]
    K = P * C
    assert weight.shape == (E, K)
    assert positions.shape == (N + 1, E)
    assert cls_token.shape[-1] == E and bias.shape == (E,)

    # ---- one-time wrapper-side layout / constant folding --------------------
    # einops 'b c (h 1) (w s2) -> b (h w) (s2 c)': one XLA transpose over data
    # the kernel reads anyway; yields a lane-dense (B, N, K) slab whose feature
    # order k = p*C + c matches PyTorch's Linear weight columns directly.
    x_k = jnp.transpose(x.reshape(B, C, N, P), (0, 2, 3, 1)).reshape(B, N, K)
    w_t = jnp.transpose(weight)                              # (K, E)
    row0 = cls_token.reshape(1, E) + positions[0:1, :]       # (1, E)
    pos_rest = positions[1:, :] + bias[None, :]              # (N, E)

    Bb = block_batch if block_batch is not None else _pick_batch_block(B, N, K, E)
    assert B % Bb == 0
    grid = (B // Bb,)

    kernel = functools.partial(_patch_embed_kernel, bb=Bb, n=N, k=K, e=E)

    out = pl.pallas_call(
        kernel,
        out_shape=jax.ShapeDtypeStruct((B, N + 1, E), jnp.float32),
        grid_spec=pltpu.PrefetchScalarGridSpec(
            num_scalar_prefetch=0,
            grid=grid,
            in_specs=[
                pl.BlockSpec((Bb, N, K), lambda i: (i, 0, 0)),
                pl.BlockSpec((K, E), lambda i: (0, 0)),
                pl.BlockSpec((1, E), lambda i: (0, 0)),
                pl.BlockSpec((N, E), lambda i: (0, 0)),
            ],
            out_specs=pl.BlockSpec((Bb, N + 1, E), lambda i: (i, 0, 0)),
        ),
        compiler_params=pltpu.CompilerParams(
            dimension_semantics=("parallel",)),
    )(x_k, w_t, row0, pos_rest)
    return out


def reference(x, weight, bias, cls_token, positions, patch_size):
    """Pure-JAX reference mirroring the PyTorch forward."""
    B, C, H, W = x.shape
    P = patch_size
    N = H * (W // P)
    patches = x.reshape(B, C, H, W // P, P)
    patches = jnp.transpose(patches, (0, 2, 3, 4, 1)).reshape(B, N, P * C)
    proj = patches @ weight.T + bias                       # (B, N, E)
    cls = jnp.broadcast_to(cls_token, (B, 1, cls_token.shape[-1]))
    out = jnp.concatenate([cls, proj], axis=1)             # (B, N+1, E)
    return out + positions[None, :, :]


if __name__ == "__main__":
    # in_channels=2, patch_size=16, emb_size=32, seq_length=128
    #  => x: (B=2, C=2, H=1, W=128), N = 8 patches, positions: (9, 32)
    B, C, H = 2, 2, 1
    patch_size = 16
    emb_size = 32
    seq_length = 128
    W = seq_length
    K = patch_size * C
    N = H * (W // patch_size)

    key = jax.random.PRNGKey(0)
    kx, kw, kb, kc, kp = jax.random.split(key, 5)

    x = jax.random.normal(kx, (B, C, H, W), dtype=jnp.float32)
    # nn.Linear(patch_size*in_channels, emb_size): weight (E, K), bias (E,)
    weight = jax.random.normal(kw, (emb_size, K), dtype=jnp.float32) * (1.0 / K ** 0.5)
    bias = jax.random.normal(kb, (emb_size,), dtype=jnp.float32) * 0.01
    cls_token = jax.random.normal(kc, (1, 1, emb_size), dtype=jnp.float32)
    positions = jax.random.normal(kp, (N + 1, emb_size), dtype=jnp.float32)

    # Primary check (single grid step at these shapes, per the review).
    out = patch_embedding_linear(x, weight, bias, cls_token, positions, patch_size)
    out = jax.block_until_ready(out)
    ref = reference(x, weight, bias, cls_token, positions, patch_size)
    assert out.shape == (B, N + 1, emb_size), out.shape
    err = float(jnp.max(jnp.abs(out - ref)))
    assert jnp.allclose(out, ref, atol=1e-4, rtol=1e-4), err

    # Secondary check: exercise the multi-step ("parallel") batch grid path.
    B2 = 4
    x2 = jax.random.normal(jax.random.PRNGKey(1), (B2, C, H, W), dtype=jnp.float32)
    out2 = patch_embedding_linear(x2, weight, bias, cls_token, positions,
                                  patch_size, block_batch=2)
    out2 = jax.block_until_ready(out2)
    ref2 = reference(x2, weight, bias, cls_token, positions, patch_size)
    err2 = float(jnp.max(jnp.abs(out2 - ref2)))
    assert jnp.allclose(out2, ref2, atol=1e-4, rtol=1e-4), err2

    print("KERNEL_OK")
</pallas_src>

<mosaic_0001>
module attributes {stable_mosaic.version = 11 : i64} {
  func.func @_patch_embed_kernel(%arg0: i32, %arg1: memref<2x8x32xf32, #tpu.memory_space<vmem>>, %arg2: memref<32x32xf32, #tpu.memory_space<vmem>>, %arg3: memref<1x32xf32, #tpu.memory_space<vmem>>, %arg4: memref<8x32xf32, #tpu.memory_space<vmem>>, %arg5: memref<2x9x32xf32, #tpu.memory_space<vmem>>) attributes {dimension_semantics = [#tpu.dimension_semantics<parallel>], iteration_bounds = array<i64: 1>, scalar_prefetch = 0 : i64, scratch_operands = 0 : i64, tpu.core_type = #tpu.core_type<tc>, window_params = [{transform_indices = @transform_0, window_bounds = array<i64: 2, 8, 32>}, {pipeline_mode = #tpu.pipeline_mode<synchronous>, transform_indices = @transform_1, window_bounds = array<i64: 32, 32>}, {pipeline_mode = #tpu.pipeline_mode<synchronous>, transform_indices = @transform_2, window_bounds = array<i64: 1, 32>}, {pipeline_mode = #tpu.pipeline_mode<synchronous>, transform_indices = @transform_3, window_bounds = array<i64: 8, 32>}, {transform_indices = @transform_4, window_bounds = array<i64: 2, 9, 32>}]} {
    %c0 = arith.constant 0 : index
    %c0_0 = arith.constant 0 : index
    %c0_1 = arith.constant 0 : index
    %0 = vector.load %arg1[%c0, %c0_0, %c0_1] : memref<2x8x32xf32, #tpu.memory_space<vmem>>, vector<2x8x32xf32>
    %1 = vector.shape_cast %0 : vector<2x8x32xf32> to vector<16x32xf32>
    %c0_2 = arith.constant 0 : index
    %c0_3 = arith.constant 0 : index
    %2 = vector.load %arg2[%c0_2, %c0_3] : memref<32x32xf32, #tpu.memory_space<vmem>>, vector<32x32xf32>
    %cst = arith.constant dense<0.000000e+00> : vector<16x32xf32>
    %3 = tpu.matmul %1, %2, %cst {dimension_numbers = #tpu.dot_dimension_numbers<[1], [0], [0], [1], [0, 0, 1, 1], [], []>} : vector<16x32xf32>, vector<32x32xf32>, vector<16x32xf32> -> vector<16x32xf32>
    %4 = vector.shape_cast %3 : vector<16x32xf32> to vector<2x8x32xf32>
    %c0_4 = arith.constant 0 : index
    %c0_5 = arith.constant 0 : index
    %5 = vector.load %arg4[%c0_4, %c0_5] : memref<8x32xf32, #tpu.memory_space<vmem>>, vector<8x32xf32>
    %6 = vector.shape_cast %5 : vector<8x32xf32> to vector<1x8x32xf32>
    %7 = vector.broadcast %6 : vector<1x8x32xf32> to vector<2x8x32xf32>
    %8 = arith.addf %4, %7 : vector<2x8x32xf32>
    %c0_6 = arith.constant 0 : index
    %c0_7 = arith.constant 0 : index
    %9 = vector.load %arg3[%c0_6, %c0_7] : memref<1x32xf32, #tpu.memory_space<vmem>>, vector<1x32xf32>
    %10 = vector.shape_cast %9 : vector<1x32xf32> to vector<1x1x32xf32>
    %11 = vector.shape_cast %10 : vector<1x1x32xf32> to vector<1x1x32xf32>
    %12 = vector.broadcast %11 : vector<1x1x32xf32> to vector<2x1x32xf32>
    %13 = tpu.concatenate %12, %8 in 1 : vector<2x1x32xf32>, vector<2x8x32xf32> -> vector<2x9x32xf32>
    %c0_8 = arith.constant 0 : index
    %c0_9 = arith.constant 0 : index
    %c0_10 = arith.constant 0 : index
    %14 = vector.load %arg5[%c0_8, %c0_9, %c0_10] : memref<2x9x32xf32, #tpu.memory_space<vmem>>, vector<2x9x32xf32>
    tpu.vector_store %arg5[%c0_8, %c0_9, %c0_10], %13 {strides = array<i32>} : memref<2x9x32xf32, #tpu.memory_space<vmem>>, vector<2x9x32xf32>,
    return
  }
  func.func @transform_0(%arg0: i32) -> (i32, i32, i32) {
    %c0_i32 = arith.constant 0 : i32
    %c0_i32_0 = arith.constant 0 : i32
    %c0_i32_1 = arith.constant 0 : i32
    return %arg0, %c0_i32, %c0_i32_0 : i32, i32, i32
  }
  func.func @transform_1(%arg0: i32) -> (i32, i32) {
    %c0_i32 = arith.constant 0 : i32
    %c0_i32_0 = arith.constant 0 : i32
    %c0_i32_1 = arith.constant 0 : i32
    return %c0_i32, %c0_i32_0 : i32, i32
  }
  func.func @transform_2(%arg0: i32) -> (i32, i32) {
    %c0_i32 = arith.constant 0 : i32
    %c0_i32_0 = arith.constant 0 : i32
    %c0_i32_1 = arith.constant 0 : i32
    return %c0_i32, %c0_i32_0 : i32, i32
  }
  func.func @transform_3(%arg0: i32) -> (i32, i32) {
    %c0_i32 = arith.constant 0 : i32
    %c0_i32_0 = arith.constant 0 : i32
    %c0_i32_1 = arith.constant 0 : i32
    return %c0_i32, %c0_i32_0 : i32, i32
  }
  func.func @transform_4(%arg0: i32) -> (i32, i32, i32) {
    %c0_i32 = arith.constant 0 : i32
    %c0_i32_0 = arith.constant 0 : i32
    %c0_i32_1 = arith.constant 0 : i32
    return %arg0, %c0_i32, %c0_i32_0 : i32, i32, i32
  }
}

</mosaic_0001>

<bundles_post_ra>
// kernel: tpu_custom_call.1
= control target key start
LH: loop header
LB: loop body
LE: loop exit
PB: predicated region body
PF: predicated region fallthrough
CT: control target
= control target key end

     0   :  { %9 = vsyncpa [#allocation3], 0  ;;  %s314_s0 = inlined_call_operand.hbm [shape: f32[2,8,32], index: 0, kind: input, shape index: {}]   ;;  %s315_s1 = inlined_call_operand.hbm [shape: f32[32,32], index: 1, kind: input, shape index: {}]   ;;  %s316_s2 = inlined_call_operand.vmem [shape: f32[1,32], index: 2, kind: input, shape index: {}]   ;;  %s317_s3 = inlined_call_operand.hbm [shape: f32[8,32], index: 3, kind: input, shape index: {}]   ;;  %s318_s4 = inlined_call_operand.vmem [shape: f32[2,9,32], index: 4, kind: output, shape index: {}]  }
   0x1   :  { %10 = vsyncpa [#allocation5], 0  ;;  %s256_s15 = smov [#allocation4]   ;;  %s257_s17 = smov [#allocation2]  }
   0x2   :  { %s28_s16 = sshll.u32 %s256_s15, 4  ;;  %s16_s18 = sshll.u32 %s257_s17, 4  ;;  %s29_s16 = int_to_ptr.vmem [resolvable:$true] %s28_s16  ;;  %s17_s18 = int_to_ptr.vmem [resolvable:$true] %s16_s18 }
   0x3   :  { %s200_s19 = scalar_lea.vmem %s29_s16, 512  ;;  %p205_p1 = scmp.lt.s32.totalorder %s29_s16, %s29_s16 }
   0x4   :  { %p201_p0 = scmp.ne.s32.totalorder %s29_s16, %s200_s19  ;;  %p206_p2 = scmp.lt.s32.totalorder %s200_s19, %s200_s19 }
   0x6   :  { %p207_p3 = por %p206_p2, %p205_p1 }
   0x8   :  { %p208_p4 = pnand %p207_p3, %p201_p0 }
   0xa   :  { %211 = shalt.err (!%p208_p4)
}
   0xb   :  { %s258_s20 = smov 128   ;;  %s259_s21 = smov 8  }
   0xc   :  { %34 = dma.hbm_to_vmem [thread:$0]  %s315_s1, 512, %s29_s16, [#allocation5], %s258_s20, %s258_s20, %s259_s21  }
   0xd   :  { %s220_s24 = scalar_lea.vmem %s17_s18, 256  ;;  %p225_p6 = scmp.lt.s32.totalorder %s17_s18, %s17_s18 }
   0xe   :  { %p221_p5 = scmp.ne.s32.totalorder %s17_s18, %s220_s24  ;;  %p226_p7 = scmp.lt.s32.totalorder %s220_s24, %s220_s24 }
  0x10   :  { %p227_p8 = por %p226_p7, %p225_p6 }
  0x12   :  { %p228_p9 = pnand %p227_p8, %p221_p5 }
  0x14   :  { %231 = shalt.err (!%p228_p9)
}
  0x15   :  { %22 = dma.hbm_to_vmem [thread:$0]  %s314_s0, 256, %s17_s18, [#allocation3], %s258_s20, %s258_s20, %s259_s21  }
  0x16   :  { %s260_s27 = smov [#allocation6]  }
  0x17   :  { %s43_s28 = sshll.u32 %s260_s27, 4  ;;  %s44_s28 = int_to_ptr.vmem [resolvable:$true] %s43_s28 }
  0x18   :  { %s240_s29 = scalar_lea.vmem %s44_s28, 128  ;;  %p245_p11 = scmp.lt.s32.totalorder %s44_s28, %s44_s28 }
  0x19   :  { %p241_p10 = scmp.ne.s32.totalorder %s44_s28, %s240_s29  ;;  %p246_p12 = scmp.lt.s32.totalorder %s240_s29, %s240_s29 }
  0x1b   :  { %p247_p13 = por %p246_p12, %p245_p11 }
  0x1d   :  { %p248_p0 = pnand %p247_p13, %p241_p10 }
  0x1f   :  { %251 = shalt.err (!%p248_p0)
}
  0x20   :  { %46 = dma.hbm_to_vmem [thread:$0]  %s317_s3, 128, %s44_s28, [#allocation5]  }
  0x21   :  { %252 = dma.done.wait [#allocation3], 256  }
  0x22   :  { %253 = vsyncadd [#allocation3], 4294967040 }
  0x23   :  { %254 = dma.done.wait [#allocation5], 640  }
  0x24   :  { %255 = vsyncadd [#allocation5], 4294966656  ;;  %vm62_vm0 = vcmask 261120   ;;  %v61_v0 = vld [vmem:[#allocation4 + $0x18] sm:$0xff]  ;;  %v60_v1 = vld [vmem:[#allocation4 + $0x10] sm:$0xff]  ;;  %vm154_vm1 = vcmask 1040384  }
  0x25   :  { %176 = vmatprep.subr.mxu0 %v61_v0  ;;  %v56_v2 = vld [vmem:[#allocation2] sm:$0xff]  ;;  %v59_v3 = vld [vmem:[#allocation4 + $0x8] sm:$0xff]  ;;  %v58_v4 = vld [vmem:[#allocation4] sm:$0xff]  ;;  %vm158_vm2 = vcmask 253952  }
  0x26   :  { %177 = vmatpush3.msra.mxu0 %v61_v0  ;;  %184 = vmatprep.mubr.msk.f32.mxu0 %vm62_vm0, %v56_v2  ;;  %v57_v5 = vld [vmem:[#allocation2 + $0x8] sm:$0xff]  ;;  %v144_v6 = vld [vmem:[#allocation6] sm:$0xff]  ;;  %v147_v9 = vld [vmem:[%s316_s2] sm:$0x1] }
  0x27   :  { %178 = vmatprep.subr.mxu0 %v60_v1 }
  0x28   :  { %179 = vmatpush3.msra.mxu0 %v60_v1 }
  0x29   :  { %180 = vmatprep.subr.mxu0 %v59_v3 }
  0x2a   :  { %181 = vmatpush3.msra.mxu0 %v59_v3 }
  0x2b   :  { %182 = vmatprep.subr.mxu0 %v58_v4 }
  0x2c   :  { %183 = vmatpush3.msra.mxu0 %v58_v4 }
  0x2d   :  { %185 = vmatmul.mubr.msk.f32.vlgmr.msra.gmra.mxu0 %vm62_vm0, %v57_v5 }
  0xed   :  { %v186_v7 = vpop.f32.mrf.mxu0 }
  0xee   :  { %v146_v8 = vadd.f32 %v186_v7, %v144_v6 }
  0xef   :  { %v135_v10 = vpop.f32.mrf.mxu0 }
  0xf0   :  { %v151_v11 = vrot.slane %v146_v8, 7  ;;  %v145_v12 = vadd.f32 %v144_v6, %v135_v10 }
  0xf2   :  { %v156_v13 = vsel %vm154_vm1, %v147_v9, %v151_v11  ;;  %161 = vst.msk [vmem:[%s318_s4 + $0x18] sm:$0x1] %vm158_vm2, %v151_v11  ;;  %v150_v14 = vrot.slane %v145_v12, 7 }
  0xf3   :  { %160 = vst.msk [vmem:[%s318_s4 + $0x10] sm:$0xff] %vm62_vm0, %v156_v13 }
  0xf4   :  { %v155_v15 = vsel %vm154_vm1, %v147_v9, %v150_v14  ;;  %159 = vst.msk [vmem:[%s318_s4 + $0x8] sm:$0x1] %vm158_vm2, %v150_v14 }
  0xf5   :  { %157 = vst.msk [vmem:[%s318_s4] sm:$0xff] %vm62_vm0, %v155_v15 }
  0xf6   :  { %166 = vsyncpa [#allocation3], 1 }
  0xf7   :  { %167 = vsyncpa [#allocation5], 1 }

</bundles_post_ra>
